<compile_context>
chip_gen: v6e
topology: v6e:2x2x1
jax: 0.10.0
libtpu: 0.0.40
codegen_flags: <defaults>
</compile_context>

<pallas_src>
import jax
import jax.numpy as jnp
import numpy as np
from jax.experimental import pallas as pl
from jax.experimental.pallas import tpu as pltpu


def _round_up(a: int, b: int) -> int:
    return (a + b - 1) // b * b


def _physical_vmem_bytes() -> int:
    """Per-core VMEM capacity; falls back to the smallest generation (v7x, 64 MiB) if unknown."""
    try:
        return int(pltpu.get_tpu_info().vmem_capacity_bytes)
    except Exception:
        return 64 * 1024 * 1024


def _pick_row_tile(M: int, tm_max: int) -> tuple[int, int]:
    """16-aligned row tile (bf16 packs 2 rows/sublane); shrink while padding waste exceeds ~25%."""
    M16 = _round_up(max(M, 1), 16)
    tm = min(_round_up(tm_max, 16), M16)
    while tm > 16:
        M_pad = _round_up(M16, tm)
        if (M_pad - M) / M_pad <= 0.25:
            break
        tm = _round_up(tm // 2, 16)
    return tm, _round_up(M16, tm)


def _pick_h_tile(h_dim: int, th_target: int = 1024) -> tuple[int, int]:
    """Lane-dense (multiple-of-128) h tile that evenly divides the padded h_dim."""
    h128 = _round_up(h_dim, 128)
    if h128 <= th_target:
        return h128, h128
    groups = h128 // 128
    best = 128
    for g in range(1, th_target // 128 + 1):
        if groups % g == 0:
            best = g * 128
    if best >= 512:
        return best, h128
    # No decent divisor: pad h with zero columns (exact no-op) up to a multiple of the target.
    return th_target, _round_up(h128, th_target)


def _pick_out_tile(out_pad: int, m_steps: int, tn_max: int = 4096) -> int:
    """Output-column tile: whole output by default; split to feed v7x's 2nd core / bound VMEM."""
    tn = out_pad
    if m_steps < 2 and out_pad >= 256 and (out_pad // 128) % 2 == 0:
        tn = out_pad // 2  # give the second TensorCore work when the row grid has one step
    while tn > tn_max and (tn // 128) % 2 == 0:
        tn //= 2           # bound the W2 / accumulator tile for very wide outputs
    return tn


def mlp_transformer_kernel(x_ref, w1_ref, b1_ref, w2_ref, b2_ref, o_ref, acc_ref):
    j = pl.program_id(2)

    @pl.when(j == 0)
    def _():
        acc_ref[...] = jnp.zeros_like(acc_ref)

    # fc1 chunk: (tm, in_dim) @ (in_dim, th) on the MXU, bf16 inputs, f32 accumulation.
    # The x -> bf16 cast happens here (free VPU slots) instead of a separate XLA pass.
    x = x_ref[...].astype(w1_ref.dtype)
    h = jnp.dot(x, w1_ref[...], preferred_element_type=jnp.float32)
    # Bias + ReLU in f32 on the VPU (elementwise, so per-h-chunk application is exact).
    h = jnp.maximum(h + b1_ref[...], 0.0)
    # fc2 partial product over this h chunk, accumulated in f32 in VMEM scratch.
    acc_ref[...] += jnp.dot(h.astype(w2_ref.dtype), w2_ref[...],
                            preferred_element_type=jnp.float32)

    @pl.when(j == pl.num_programs(2) - 1)
    def _():
        # dropout p=0.0 -> identity.
        # TODO(synk): training-mode dropout (p>0) is not implemented in this kernel.
        o_ref[...] = (acc_ref[...] + b2_ref[...]).astype(o_ref.dtype)


def mlp_transformer(x, w1, b1, w2, b2, *, tm=None, th=1024,
                    compute_dtype=jnp.bfloat16, out_dtype=None):
    """x: (batch, seq, in_dim). w1: (in_dim, h_dim), w2: (h_dim, out_d) (pre-transposed Linear
    weights). Returns (batch, seq, out_d) in out_dtype (defaults to x.dtype)."""
    batch, seq, in_dim = x.shape
    h_dim = w1.shape[1]
    out_d = w2.shape[1]
    M = batch * seq
    out_dtype = x.dtype if out_dtype is None else out_dtype

    phys_vmem = _physical_vmem_bytes()

    # Row tile: 512 on 128 MiB parts (v5e/v6e), 256 on 64 MiB parts (v7x); 16-aligned, waste-capped.
    if tm is None:
        tm = 512 if phys_vmem >= 96 * 1024 * 1024 else 256
    tm_eff, M_pad = _pick_row_tile(M, tm)
    num_m = M_pad // tm_eff

    # Lane-dense hidden / output widths (multiples of 128).
    th_eff, h_pad = _pick_h_tile(h_dim, th)
    num_h = h_pad // th_eff
    out_pad = _round_up(out_d, 128)
    tn_eff = _pick_out_tile(out_pad, num_m)
    num_n = out_pad // tn_eff

    # --- Wrapper-side padding (zero padding is an exact no-op and is sliced off afterwards). ---
    x2d = x.reshape(M, in_dim)  # keep source dtype; the bf16 cast happens in-kernel
    if M_pad != M:
        x2d = jnp.pad(x2d, ((0, M_pad - M), (0, 0)))

    w1c = w1.astype(compute_dtype)
    w2c = w2.astype(compute_dtype)
    b1c = jnp.asarray(b1, dtype=jnp.float32).reshape(1, h_dim)
    b2c = jnp.asarray(b2, dtype=jnp.float32).reshape(1, out_d)
    if h_pad != h_dim:
        w1c = jnp.pad(w1c, ((0, 0), (0, h_pad - h_dim)))
        b1c = jnp.pad(b1c, ((0, 0), (0, h_pad - h_dim)))
        w2c = jnp.pad(w2c, ((0, h_pad - h_dim), (0, 0)))
    if out_pad != out_d:
        w2c = jnp.pad(w2c, ((0, 0), (0, out_pad - out_d)))
        b2c = jnp.pad(b2c, ((0, 0), (0, out_pad - out_d)))

    grid = (num_m, num_n, num_h)

    # --- VMEM budget: size the limit from the actual tiles, leave headroom below physical. ---
    xb = jnp.dtype(x.dtype).itemsize
    wb = jnp.dtype(compute_dtype).itemsize
    ob = jnp.dtype(out_dtype).itemsize
    vmem_need = (
        2 * tm_eff * in_dim * xb            # x tile (double-buffered)
        + 2 * in_dim * th_eff * wb          # W1 chunk
        + 2 * 8 * th_eff * 4                # b1 chunk (sublane-padded, f32)
        + 2 * th_eff * tn_eff * wb          # W2 chunk
        + 2 * 8 * tn_eff * 4                # b2 chunk
        + 2 * tm_eff * tn_eff * ob          # out tile
        + tm_eff * tn_eff * 4               # f32 accumulator scratch
        + tm_eff * th_eff * (4 + wb)        # fc1 f32 intermediate + its bf16 copy
    )
    vmem_limit = min(max(int(vmem_need * 1.25), 32 * 1024 * 1024),
                     int(phys_vmem * 0.85))

    flops = 2 * M_pad * in_dim * h_pad * num_n + 2 * M_pad * h_pad * out_pad
    bytes_accessed = (M_pad * in_dim * xb + in_dim * h_pad * wb + h_pad * 4
                      + h_pad * out_pad * wb + out_pad * 4 + M_pad * out_pad * ob)

    out2d = pl.pallas_call(
        mlp_transformer_kernel,
        out_shape=jax.ShapeDtypeStruct((M_pad, out_pad), out_dtype),
        grid_spec=pltpu.PrefetchScalarGridSpec(
            num_scalar_prefetch=0,
            grid=grid,
            in_specs=[
                pl.BlockSpec((tm_eff, in_dim), lambda i, n, j: (i, 0)),   # x row tile
                pl.BlockSpec((in_dim, th_eff), lambda i, n, j: (0, j)),   # W1 h-chunk (bf16)
                pl.BlockSpec((1, th_eff), lambda i, n, j: (0, j)),        # b1 h-chunk (f32)
                pl.BlockSpec((th_eff, tn_eff), lambda i, n, j: (j, n)),   # W2 (h, out) chunk (bf16)
                pl.BlockSpec((1, tn_eff), lambda i, n, j: (0, n)),        # b2 out-chunk (f32)
            ],
            out_specs=pl.BlockSpec((tm_eff, tn_eff), lambda i, n, j: (i, n)),
            scratch_shapes=[pltpu.VMEM((tm_eff, tn_eff), jnp.float32)],
        ),
        compiler_params=pltpu.CompilerParams(
            # Rows and output columns are independent ("parallel" -> megacore sharding on v7x);
            # the h axis is the fc2 reduction and stays "arbitrary" (scratch accumulator).
            dimension_semantics=("parallel", "parallel", "arbitrary"),
            vmem_limit_bytes=vmem_limit,
        ),
        cost_estimate=pl.CostEstimate(flops=flops, transcendentals=0,
                                      bytes_accessed=bytes_accessed),
    )(x2d, w1c, b1c, w2c, b2c)

    out2d = out2d[:M, :out_d]
    return out2d.reshape(batch, seq, out_d)


if __name__ == "__main__":
    # Small shapes implied by the module: tokens of width in_dim -> h_dim -> out_d (= in_dim).
    batch, seq = 2, 8
    in_dim, h_dim = 32, 128
    out_d = in_dim  # out_d defaults to in_dim in the module

    key = jax.random.PRNGKey(0)
    kx, kw1, kb1, kw2, kb2 = jax.random.split(key, 5)

    x = jax.random.normal(kx, (batch, seq, in_dim), dtype=jnp.float32)
    # Deterministic "Linear" params (stored transposed: (in, out)).
    w1 = jax.random.normal(kw1, (in_dim, h_dim), dtype=jnp.float32) * 0.02
    b1 = jax.random.normal(kb1, (1, h_dim), dtype=jnp.float32) * 0.02
    w2 = jax.random.normal(kw2, (h_dim, out_d), dtype=jnp.float32) * 0.02
    b2 = jax.random.normal(kb2, (1, out_d), dtype=jnp.float32) * 0.02

    out = mlp_transformer(x, w1, b1, w2, b2)
    out = jax.block_until_ready(out)
    assert out.shape == (batch, seq, out_d)

    # Pure-JAX reference following the same bf16-input / f32-accumulate recipe
    # (dropout p=0.0 -> identity).
    xb16 = x.reshape(-1, in_dim).astype(jnp.bfloat16)
    w1b = w1.astype(jnp.bfloat16)
    w2b = w2.astype(jnp.bfloat16)
    h_ref = jnp.maximum(
        jnp.dot(xb16, w1b, preferred_element_type=jnp.float32) + b1, 0.0)
    ref = jnp.dot(h_ref.astype(jnp.bfloat16), w2b,
                  preferred_element_type=jnp.float32) + b2
    ref = ref.reshape(batch, seq, out_d).astype(x.dtype)

    np.testing.assert_allclose(np.asarray(out), np.asarray(ref), rtol=1e-2, atol=1e-2)

    print("KERNEL_OK")
</pallas_src>

<mosaic_0001>
module attributes {stable_mosaic.version = 11 : i64} {
  func.func @mlp_transformer_kernel(%arg0: i32, %arg1: i32, %arg2: i32, %arg3: memref<16x32xf32, #tpu.memory_space<vmem>>, %arg4: memref<32x128xbf16, #tpu.memory_space<vmem>>, %arg5: memref<1x128xf32, #tpu.memory_space<vmem>>, %arg6: memref<128x128xbf16, #tpu.memory_space<vmem>>, %arg7: memref<1x128xf32, #tpu.memory_space<vmem>>, %arg8: memref<16x128xf32, #tpu.memory_space<vmem>>, %arg9: memref<16x128xf32, #tpu.memory_space<vmem>>) attributes {dimension_semantics = [#tpu.dimension_semantics<parallel>, #tpu.dimension_semantics<parallel>, #tpu.dimension_semantics<arbitrary>], iteration_bounds = array<i64: 1, 1, 1>, scalar_prefetch = 0 : i64, scratch_operands = 1 : i64, tpu.core_type = #tpu.core_type<tc>, window_params = [{transform_indices = @transform_0, window_bounds = array<i64: 16, 32>}, {transform_indices = @transform_1, window_bounds = array<i64: 32, 128>}, {transform_indices = @transform_2, window_bounds = array<i64: 1, 128>}, {transform_indices = @transform_3, window_bounds = array<i64: 128, 128>}, {transform_indices = @transform_4, window_bounds = array<i64: 1, 128>}, {transform_indices = @transform_5, window_bounds = array<i64: 16, 128>}]} {
    %c0_i32 = arith.constant 0 : i32
    %0 = arith.cmpi eq, %arg2, %c0_i32 : i32
    %1 = arith.extui %0 : i1 to i32
    %c0_i32_0 = arith.constant 0 : i32
    %2 = arith.cmpi ne, %1, %c0_i32_0 : i32
    scf.if %2 {
      %cst_16 = arith.constant 0.000000e+00 : f32
      %21 = vector.broadcast %cst_16 : f32 to vector<16x128xf32>
      %c0_17 = arith.constant 0 : index
      %c0_18 = arith.constant 0 : index
      %22 = vector.load %arg9[%c0_17, %c0_18] : memref<16x128xf32, #tpu.memory_space<vmem>>, vector<16x128xf32>
      tpu.vector_store %arg9[%c0_17, %c0_18], %21 {strides = array<i32>} : memref<16x128xf32, #tpu.memory_space<vmem>>, vector<16x128xf32>,
    } else {
    }
    %c0 = arith.constant 0 : index
    %c0_1 = arith.constant 0 : index
    %3 = vector.load %arg3[%c0, %c0_1] : memref<16x32xf32, #tpu.memory_space<vmem>>, vector<16x32xf32>
    %4 = arith.truncf %3 : vector<16x32xf32> to vector<16x32xbf16>
    %c0_2 = arith.constant 0 : index
    %c0_3 = arith.constant 0 : index
    %5 = vector.load %arg4[%c0_2, %c0_3] : memref<32x128xbf16, #tpu.memory_space<vmem>>, vector<32x128xbf16>
    %cst = arith.constant dense<0.000000e+00> : vector<16x128xf32>
    %6 = tpu.matmul %4, %5, %cst {dimension_numbers = #tpu.dot_dimension_numbers<[1], [0], [0], [1], [0, 0, 1, 1], [], []>} : vector<16x32xbf16>, vector<32x128xbf16>, vector<16x128xf32> -> vector<16x128xf32>
    %c0_4 = arith.constant 0 : index
    %c0_5 = arith.constant 0 : index
    %7 = vector.load %arg5[%c0_4, %c0_5] : memref<1x128xf32, #tpu.memory_space<vmem>>, vector<1x128xf32>
    %8 = vector.broadcast %7 : vector<1x128xf32> to vector<16x128xf32>
    %9 = arith.addf %6, %8 : vector<16x128xf32>
    %cst_6 = arith.constant 0.000000e+00 : f32
    %10 = vector.broadcast %cst_6 : f32 to vector<16x128xf32>
    %11 = arith.maximumf %9, %10 : vector<16x128xf32>
    %c0_7 = arith.constant 0 : index
    %c0_8 = arith.constant 0 : index
    %12 = vector.load %arg9[%c0_7, %c0_8] : memref<16x128xf32, #tpu.memory_space<vmem>>, vector<16x128xf32>
    %13 = arith.truncf %11 : vector<16x128xf32> to vector<16x128xbf16>
    %c0_9 = arith.constant 0 : index
    %c0_10 = arith.constant 0 : index
    %14 = vector.load %arg6[%c0_9, %c0_10] : memref<128x128xbf16, #tpu.memory_space<vmem>>, vector<128x128xbf16>
    %cst_11 = arith.constant dense<0.000000e+00> : vector<16x128xf32>
    %15 = tpu.matmul %13, %14, %cst_11 {dimension_numbers = #tpu.dot_dimension_numbers<[1], [0], [0], [1], [0, 0, 1, 1], [], []>} : vector<16x128xbf16>, vector<128x128xbf16>, vector<16x128xf32> -> vector<16x128xf32>
    %16 = arith.addf %12, %15 : vector<16x128xf32>
    %c0_12 = arith.constant 0 : index
    %c0_13 = arith.constant 0 : index
    %17 = vector.load %arg9[%c0_12, %c0_13] : memref<16x128xf32, #tpu.memory_space<vmem>>, vector<16x128xf32>
    tpu.vector_store %arg9[%c0_12, %c0_13], %16 {strides = array<i32>} : memref<16x128xf32, #tpu.memory_space<vmem>>, vector<16x128xf32>,
    %c0_i32_14 = arith.constant 0 : i32
    %18 = arith.cmpi eq, %arg2, %c0_i32_14 : i32
    %19 = arith.extui %18 : i1 to i32
    %c0_i32_15 = arith.constant 0 : i32
    %20 = arith.cmpi ne, %19, %c0_i32_15 : i32
    scf.if %20 {
      %c0_16 = arith.constant 0 : index
      %c0_17 = arith.constant 0 : index
      %21 = vector.load %arg9[%c0_16, %c0_17] : memref<16x128xf32, #tpu.memory_space<vmem>>, vector<16x128xf32>
      %c0_18 = arith.constant 0 : index
      %c0_19 = arith.constant 0 : index
      %22 = vector.load %arg7[%c0_18, %c0_19] : memref<1x128xf32, #tpu.memory_space<vmem>>, vector<1x128xf32>
      %23 = vector.broadcast %22 : vector<1x128xf32> to vector<16x128xf32>
      %24 = arith.addf %21, %23 : vector<16x128xf32>
      %c0_20 = arith.constant 0 : index
      %c0_21 = arith.constant 0 : index
      %25 = vector.load %arg8[%c0_20, %c0_21] : memref<16x128xf32, #tpu.memory_space<vmem>>, vector<16x128xf32>
      tpu.vector_store %arg8[%c0_20, %c0_21], %24 {strides = array<i32>} : memref<16x128xf32, #tpu.memory_space<vmem>>, vector<16x128xf32>,
    } else {
    }
    return
  }
  func.func @transform_0(%arg0: i32, %arg1: i32, %arg2: i32) -> (i32, i32) {
    %c0_i32 = arith.constant 0 : i32
    %c0_i32_0 = arith.constant 0 : i32
    return %arg0, %c0_i32 : i32, i32
  }
  func.func @transform_1(%arg0: i32, %arg1: i32, %arg2: i32) -> (i32, i32) {
    %c0_i32 = arith.constant 0 : i32
    %c0_i32_0 = arith.constant 0 : i32
    return %c0_i32, %arg2 : i32, i32
  }
  func.func @transform_2(%arg0: i32, %arg1: i32, %arg2: i32) -> (i32, i32) {
    %c0_i32 = arith.constant 0 : i32
    %c0_i32_0 = arith.constant 0 : i32
    return %c0_i32, %arg2 : i32, i32
  }
  func.func @transform_3(%arg0: i32, %arg1: i32, %arg2: i32) -> (i32, i32) {
    %c0_i32 = arith.constant 0 : i32
    return %arg2, %arg1 : i32, i32
  }
  func.func @transform_4(%arg0: i32, %arg1: i32, %arg2: i32) -> (i32, i32) {
    %c0_i32 = arith.constant 0 : i32
    %c0_i32_0 = arith.constant 0 : i32
    return %c0_i32, %arg1 : i32, i32
  }
  func.func @transform_5(%arg0: i32, %arg1: i32, %arg2: i32) -> (i32, i32) {
    %c0_i32 = arith.constant 0 : i32
    return %arg0, %arg1 : i32, i32
  }
}

</mosaic_0001>

<bundles_post_ra>
// kernel: tpu_custom_call.1
= control target key start
LH: loop header
LB: loop body
LE: loop exit
PB: predicated region body
PF: predicated region fallthrough
CT: control target
= control target key end

     0   :  { %10 = vsyncpa [#allocation4], 0  ;;  %s511_s0 = inlined_call_operand.hbm [shape: f32[16,32], index: 0, kind: input, shape index: {}]   ;;  %s512_s1 = inlined_call_operand.hbm [shape: bf16[32,128], index: 1, kind: input, shape index: {}]   ;;  %s513_s2 = inlined_call_operand.vmem [shape: f32[1,128], index: 2, kind: input, shape index: {}]   ;;  %s514_s3 = inlined_call_operand.hbm [shape: bf16[128,128], index: 3, kind: input, shape index: {}]   ;;  %s515_s4 = inlined_call_operand.vmem [shape: f32[1,128], index: 4, kind: input, shape index: {}]   ;;  %s516_s5 = inlined_call_operand.hbm [shape: f32[16,128], index: 5, kind: output, shape index: {}]  }
   0x1   :  { %11 = vsyncpa [#allocation7], 0 }
   0x2   :  { %12 = vsyncpa [#allocation5], 0  ;;  %s447_s18 = smov [#allocation6]  }
   0x3   :  { %s30_s19 = sshll.u32 %s447_s18, 4  ;;  %s31_s19 = int_to_ptr.vmem [resolvable:$true] %s30_s19 }
   0x4   :  { %s369_s20 = scalar_lea.vmem %s31_s19, 256  ;;  %p374_p1 = scmp.lt.s32.totalorder %s31_s19, %s31_s19 }
   0x5   :  { %p370_p0 = scmp.ne.s32.totalorder %s31_s19, %s369_s20  ;;  %p375_p2 = scmp.lt.s32.totalorder %s369_s20, %s369_s20 }
   0x7   :  { %p376_p3 = por %p375_p2, %p374_p1 }
   0x9   :  { %p377_p4 = pnand %p376_p3, %p370_p0 }
   0xb   :  { %380 = shalt.err (!%p377_p4)
}
   0xc   :  { %s448_s21 = smov 64   ;;  %s449_s22 = smov 4  }
   0xd   :  { %36 = dma.hbm_to_vmem [thread:$0]  %s512_s1, 256, %s31_s19, [#allocation7], %s448_s21, %s448_s21, %s449_s22  }
   0xe   :  { %s450_s25 = smov [#allocation3]  }
   0xf   :  { %s18_s26 = sshll.u32 %s450_s25, 4  ;;  %s19_s26 = int_to_ptr.vmem [resolvable:$true] %s18_s26 }
  0x10   :  { %s389_s27 = scalar_lea.vmem %s19_s26, 256  ;;  %p394_p6 = scmp.lt.s32.totalorder %s19_s26, %s19_s26 }
  0x11   :  { %p390_p5 = scmp.ne.s32.totalorder %s19_s26, %s389_s27  ;;  %p395_p7 = scmp.lt.s32.totalorder %s389_s27, %s389_s27 }
  0x13   :  { %p396_p8 = por %p395_p7, %p394_p6 }
  0x15   :  { %p397_p9 = pnand %p396_p8, %p390_p5 }
  0x17   :  { %400 = shalt.err (!%p397_p9)
}
  0x18   :  { %s451_s28 = smov 128   ;;  %s452_s29 = smov 8  }
  0x19   :  { %24 = dma.hbm_to_vmem [thread:$0]  %s511_s0, 256, %s19_s26, [#allocation4], %s451_s28, %s451_s28, %s452_s29  }
  0x1a   :  { %s453_s1 = smov [#allocation8]  }
  0x1b   :  { %s44_s7 = sshll.u32 %s453_s1, 4  ;;  %s45_s7 = int_to_ptr.vmem [resolvable:$true] %s44_s7 }
  0x1c   :  { %s409_s8 = scalar_lea.vmem %s45_s7, 1024  ;;  %p414_p11 = scmp.lt.s32.totalorder %s45_s7, %s45_s7 }
  0x1d   :  { %p410_p10 = scmp.ne.s32.totalorder %s45_s7, %s409_s8  ;;  %p415_p12 = scmp.lt.s32.totalorder %s409_s8, %s409_s8 }
  0x1f   :  { %p416_p13 = por %p415_p12, %p414_p11 }
  0x21   :  { %p417_p0 = pnand %p416_p13, %p410_p10 }
  0x23   :  { %420 = shalt.err (!%p417_p0)
}
  0x24   :  { %50 = dma.hbm_to_vmem [thread:$0]  %s514_s3, 1024, %s45_s7, [#allocation7], %s448_s21, %s448_s21, %s449_s22  }
  0x25   :  { %441 = dma.done.wait [#allocation4], 256  }
  0x26   :  { %442 = vsyncadd [#allocation4], 4294967040 }
  0x27   :  { %443 = dma.done.wait [#allocation7], 1280  }
  0x28   :  { %444 = vsyncadd [#allocation7], 4294966016  ;;  %v454_v0 = vmov 0.0   ;;  %vm455_vm0 = vmmov 0   ;;  %v351_v1 = vld [vmem:[#allocation6 + $0x8] sm:$0xff]   ;;  %v352_v2 = vld [vmem:[#allocation6] sm:$0xff]  }
  0x29   :  { %313 = vmatprep.subr.bf16.mxu0 %v454_v0  ;;  %317 = vmatprep.mubr.msk.bf16.mxu0 %vm455_vm0, %v454_v0  ;;  %v69_v3 = vld [vmem:[#allocation3] sm:$0xff]  ;;  %v70_v4 = vld [vmem:[#allocation3 + $0x8] sm:$0xff]  ;;  %v353_v5 = vld [vmem:[#allocation8 + $0x38] sm:$0xff]   ;;  %vm95_vm1 = vcmask 261120   ;;  %s456_s13 = smov [#allocation9]  }
  0x2a   :  { %321 = vmatprep.subr.bf16.mxu1 %v454_v0  ;;  %337 = vmatprep.mubr.msk.bf16.mxu1 %vm455_vm0, %v454_v0  ;;  %v71_v6 = vpack.c.bf16 %v70_v4, %v69_v3  ;;  %v354_v7 = vld [vmem:[#allocation8 + $0x30] sm:$0xff]   ;;  %v355_v8 = vld [vmem:[#allocation8 + $0x28] sm:$0xff]   ;;  %v356_v9 = vld [vmem:[#allocation8 + $0x20] sm:$0xff]   ;;  %s275_s14 = sshll.u32 %s456_s13, 4  ;;  %s276_s14 = int_to_ptr.vmem [resolvable:$true] %s275_s14 }
  0x2b   :  { %314 = vmatpush3.bf16.msra.mxu0 %v351_v1  ;;  %322 = vmatpush3.bf16.msra.mxu1 %v353_v5  ;;  %v357_v10 = vld [vmem:[#allocation8 + $0x18] sm:$0xff]   ;;  %v358_v11 = vld [vmem:[#allocation8 + $0x10] sm:$0xff]   ;;  %v359_v12 = vld [vmem:[#allocation8 + $0x8] sm:$0xff]   ;;  %p426_p2 = scmp.lt.s32.totalorder %s276_s14, %s276_s14 }
  0x2c   :  { %315 = vmatprep.subr.bf16.mxu0 %v454_v0  ;;  %323 = vmatprep.subr.bf16.mxu1 %v454_v0  ;;  %v360_v13 = vld [vmem:[#allocation8] sm:$0xff]  }
  0x2d   :  { %v288_v14 = vld [vmem:[%s513_s2] ss:$0 sm:$0xff]  ;;  %s421_s2 = scalar_lea.vmem %s276_s14, 256 }
  0x2e   :  { %v300_v24 = vld [vmem:[%s515_s4] ss:$0 sm:$0xff]  ;;  %p422_p1 = scmp.ne.s32.totalorder %s276_s14, %s421_s2  ;;  %p427_p3 = scmp.lt.s32.totalorder %s421_s2, %s421_s2 }
  0x2f   :  { %316 = vmatpush3.bf16.msra.mxu0 %v352_v2  ;;  %324 = vmatpush3.bf16.msra.mxu1 %v354_v7 }
  0x30   :  { %325 = vmatprep.subr.bf16.mxu1 %v454_v0  ;;  %p428_p4 = por %p427_p3, %p426_p2 }
  0x32   :  { %318 = vmatmul.mubr.msk.bf16.vlgmr.msra.gmra.mxu0 %vm95_vm1, %v71_v6  ;;  %p429_p5 = pnand %p428_p4, %p422_p1 }
  0x33   :  { %326 = vmatpush3.bf16.msra.mxu1 %v355_v8 }
  0x34   :  { %327 = vmatprep.subr.bf16.mxu1 %v454_v0 }
  0x37   :  { %328 = vmatpush3.bf16.msra.mxu1 %v356_v9 }
  0x38   :  { %329 = vmatprep.subr.bf16.mxu1 %v454_v0 }
  0x3b   :  { %330 = vmatpush3.bf16.msra.mxu1 %v357_v10 }
  0x3c   :  { %331 = vmatprep.subr.bf16.mxu1 %v454_v0 }
  0x3f   :  { %332 = vmatpush3.bf16.msra.mxu1 %v358_v11 }
  0x40   :  { %333 = vmatprep.subr.bf16.mxu1 %v454_v0 }
  0x43   :  { %334 = vmatpush3.bf16.msra.mxu1 %v359_v12 }
  0x44   :  { %335 = vmatprep.subr.bf16.mxu1 %v454_v0 }
  0x47   :  { %336 = vmatpush3.bf16.msra.mxu1 %v360_v13 }
  0xf2   :  { %v133_v15 = vpop.f32.mrf.mxu0 }
  0xf3   :  { %v134_v17 = vadd.f32 %v288_v14, %v133_v15 }
  0xf4   :  { %v319_v16 = vpop.f32.mrf.mxu0 }
  0xf5   :  { %v140_v21 = vmax.f32 %v134_v17, 0.0 }
  0xf6   :  { %v136_v18 = vpop.f32.mrf.mxu0 }
  0xf7   :  { %v137_v19 = vadd.f32 %v288_v14, %v136_v18 }
  0xf8   :  { %v320_v20 = vpop.f32.mrf.mxu0 }
  0xf9   :  { %v141_v22 = vmax.f32 %v137_v19, 0.0 }
  0xfb   :  { %v144_v23 = vpack.c.bf16 %v141_v22, %v140_v21 }
  0xfd   :  { %338 = vmatmul.mubr.bf16.vlgmr.msra.gmra.mxu1 %v144_v23 }
 0x1bd   :  { %v243_v25 = vpop.f32.mrf.mxu1 }
 0x1be   :  { %v266_v26 = vadd.f32 %v300_v24, %v243_v25 }
 0x1bf   :  { %v339_v27 = vpop.f32.mrf.mxu1 }
 0x1c0   :  { %268 = vst [vmem:[#allocation9] sm:$0xff] %v266_v26 }
 0x1c1   :  { %v246_v28 = vpop.f32.mrf.mxu1 }
 0x1c2   :  { %v267_v29 = vadd.f32 %v300_v24, %v246_v28 }
 0x1c3   :  { %v340_v30 = vpop.f32.mrf.mxu1 }
 0x1c4   :  { %269 = vst [vmem:[#allocation9 + $0x8] sm:$0xff] %v267_v29 }
 0x1c5   :  { %432 = shalt.err (!%p429_p5)
}
 0x1c6   :  { %281 = dma.vmem_to_hbm [thread:$0]  %s276_s14, 256, %s516_s5, [#allocation5], %s451_s28, %s451_s28, %s452_s29  }
 0x1c7   :  { %445 = dma.done.wait [#allocation5], 256  }
 0x1c8   :  { %446 = vsyncadd [#allocation5], 4294967040 }
 0x1c9   :  { %285 = vsyncpa [#allocation4], 1 }
 0x1ca   :  { %286 = vsyncpa [#allocation7], 1 }
 0x1cb   :  { %287 = vsyncpa [#allocation5], 1 }

</bundles_post_ra>
